<compile_context>
chip_gen: v7x
topology: tpu7x:2x2x1
jax: 0.10.0
libtpu: 0.0.40
codegen_flags: <defaults>
</compile_context>

<pallas_src>
import math

import jax
import jax.numpy as jnp
from jax.experimental import pallas as pl
from jax.experimental.pallas import tpu as pltpu

LOG_STD_MAX = 2.0
LOG_STD_MIN = -20.0
_HALF_LOG_2PI = 0.5 * math.log(2.0 * math.pi)
_LOG2 = math.log(2.0)
LANE = 128


def _round_up(x, m):
    return ((x + m - 1) // m) * m


def make_actor_kernel(act_limit: float, act_dim: int, adp: int):
    """adp = act_dim rounded up to a multiple of 128 lanes."""

    def actor_kernel(obs_ref, eps_ref,
                     w0_ref, b0_ref, w1_ref, b1_ref,
                     wh_ref, bh_ref,
                     act_ref, logp_ref):
        x = obs_ref[...]

        # MLP trunk: Linear -> ReLU -> Linear -> ReLU
        # (mlp([obs]+hidden, activation, activation) => ReLU after both layers)
        h = jnp.dot(x, w0_ref[...], preferred_element_type=jnp.float32) + b0_ref[...]
        h = jnp.maximum(h, 0.0)
        h = jnp.dot(h, w1_ref[...], preferred_element_type=jnp.float32) + b1_ref[...]
        h = jnp.maximum(h, 0.0)

        # Fused heads: single MXU issue. Lanes [0:adp) = mu, [adp:2*adp) = log_std.
        heads = jnp.dot(h, wh_ref[...], preferred_element_type=jnp.float32) + bh_ref[...]
        mu = heads[:, :adp]
        log_std = jnp.clip(heads[:, adp:], LOG_STD_MIN, LOG_STD_MAX)
        std = jnp.exp(log_std)

        eps = eps_ref[...]          # padded lanes hold 0
        pi = mu + std * eps         # rsample

        # Normal(mu, std).log_prob(pi) with z == eps, fused with the
        # tanh-squash correction, reduced in a single masked sum.
        softplus_m2p = jnp.logaddexp(0.0, -2.0 * pi)        # softplus(-2*pi)
        per_elem = (-0.5 * eps * eps - log_std - _HALF_LOG_2PI
                    - 2.0 * (_LOG2 - pi - softplus_m2p))
        lane_ids = jax.lax.broadcasted_iota(jnp.int32, per_elem.shape, 1)
        per_elem = jnp.where(lane_ids < act_dim, per_elem, 0.0)
        logp = jnp.sum(per_elem, axis=-1, keepdims=True)

        # Lane-dense stores (padded action lanes are tanh(0) = 0).
        act_ref[...] = (act_limit * jnp.tanh(pi)).astype(act_ref.dtype)
        logp_ref[...] = jnp.broadcast_to(logp, logp_ref.shape).astype(logp_ref.dtype)

    return actor_kernel


def squashed_gaussian_actor(obs, eps, params, act_limit, *, tb_max=512):
    """obs: (B, obs_dim) f32, eps: (B, act_dim) f32 standard-normal noise."""
    B, obs_dim = obs.shape
    h0 = params["w0"].shape[1]
    h1 = params["w1"].shape[1]
    act_dim = params["wmu"].shape[1]

    adp = _round_up(act_dim, LANE)          # lane-dense head / action width

    # Fuse + zero-pad the two heads into one (h1, 2*adp) weight matrix.
    wh = jnp.zeros((h1, 2 * adp), jnp.float32)
    wh = wh.at[:, :act_dim].set(params["wmu"])
    wh = wh.at[:, adp:adp + act_dim].set(params["wls"])
    bh = jnp.zeros((1, 2 * adp), jnp.float32)
    bh = bh.at[:, :act_dim].set(params["bmu"])
    bh = bh.at[:, adp:adp + act_dim].set(params["bls"])

    # Batch tiling: TB is a multiple of 8 (f32 sublanes); weights are resident
    # in VMEM across all grid steps (block index never changes).
    tb = min(tb_max, _round_up(B, 8))
    b_pad = _round_up(B, tb)
    obs_p = jnp.zeros((b_pad, obs_dim), jnp.float32).at[:B].set(obs)
    eps_p = jnp.zeros((b_pad, adp), jnp.float32).at[:B, :act_dim].set(eps)

    kernel = make_actor_kernel(float(act_limit), int(act_dim), int(adp))

    batched = lambda i: (i, 0)
    resident = lambda i: (0, 0)

    act_p, logp_p = pl.pallas_call(
        kernel,
        out_shape=(
            jax.ShapeDtypeStruct((b_pad, adp), jnp.float32),
            jax.ShapeDtypeStruct((b_pad, LANE), jnp.float32),
        ),
        grid=(b_pad // tb,),
        in_specs=[
            pl.BlockSpec((tb, obs_dim), batched),     # obs
            pl.BlockSpec((tb, adp), batched),         # eps (padded)
            pl.BlockSpec((obs_dim, h0), resident),    # w0
            pl.BlockSpec((1, h0), resident),          # b0
            pl.BlockSpec((h0, h1), resident),         # w1
            pl.BlockSpec((1, h1), resident),          # b1
            pl.BlockSpec((h1, 2 * adp), resident),    # fused head weights
            pl.BlockSpec((1, 2 * adp), resident),     # fused head biases
        ],
        out_specs=(
            pl.BlockSpec((tb, adp), batched),
            pl.BlockSpec((tb, LANE), batched),
        ),
        compiler_params=pltpu.CompilerParams(
            dimension_semantics=("parallel",)),
    )(obs_p, eps_p,
      params["w0"], params["b0"], params["w1"], params["b1"], wh, bh)

    # TODO(synk): for production hidden widths on v6e/v7x, cast matmul operands
    # to bf16 (keep preferred_element_type=f32 and the epilogue in f32).
    return act_p[:B, :act_dim], logp_p[:B, 0]


def init_linear(key, fan_in, fan_out):
    # PyTorch nn.Linear default init: U(-1/sqrt(fan_in), 1/sqrt(fan_in))
    kw, kb = jax.random.split(key)
    bound = 1.0 / math.sqrt(fan_in)
    w = jax.random.uniform(kw, (fan_in, fan_out), jnp.float32, -bound, bound)
    b = jax.random.uniform(kb, (1, fan_out), jnp.float32, -bound, bound)
    return w, b


def reference_forward(obs, eps, params, act_limit):
    # Pure-JAX reference mirroring the PyTorch module.
    h = jnp.maximum(obs @ params["w0"] + params["b0"], 0.0)
    h = jnp.maximum(h @ params["w1"] + params["b1"], 0.0)
    mu = h @ params["wmu"] + params["bmu"]
    log_std = jnp.clip(h @ params["wls"] + params["bls"], LOG_STD_MIN, LOG_STD_MAX)
    std = jnp.exp(log_std)
    pi = mu + std * eps
    z = (pi - mu) / std
    logp = jnp.sum(-0.5 * z * z - log_std - 0.5 * jnp.log(2.0 * jnp.pi), axis=-1)
    logp = logp - jnp.sum(2.0 * (jnp.log(2.0) - pi - jax.nn.softplus(-2.0 * pi)), axis=-1)
    return act_limit * jnp.tanh(pi), logp


if __name__ == "__main__":
    # Small, forward-consistent shapes
    B, obs_dim, hidden, act_dim = 8, 16, (32, 32), 8
    act_limit = 1.0

    root = jax.random.PRNGKey(0)
    k_obs, k_eps, k0, k1, kmu, kls = jax.random.split(root, 6)

    obs = jax.random.normal(k_obs, (B, obs_dim), jnp.float32)
    eps = jax.random.normal(k_eps, (B, act_dim), jnp.float32)  # rsample noise

    w0, b0 = init_linear(k0, obs_dim, hidden[0])
    w1, b1 = init_linear(k1, hidden[0], hidden[1])
    wmu, bmu = init_linear(kmu, hidden[1], act_dim)
    wls, bls = init_linear(kls, hidden[1], act_dim)
    params = dict(w0=w0, b0=b0, w1=w1, b1=b1, wmu=wmu, bmu=bmu, wls=wls, bls=bls)

    pi_action, logp_pi = squashed_gaussian_actor(obs, eps, params, act_limit)
    jax.block_until_ready((pi_action, logp_pi))

    ref_pi, ref_logp = reference_forward(obs, eps, params, act_limit)
    assert pi_action.shape == (B, act_dim)
    assert logp_pi.shape == (B,)
    assert jnp.allclose(pi_action, ref_pi, atol=1e-5, rtol=1e-5)
    assert jnp.allclose(logp_pi, ref_logp, atol=1e-4, rtol=1e-4)

    print("KERNEL_OK")
</pallas_src>

<mosaic_0001>
module attributes {stable_mosaic.version = 11 : i64} {
  func.func @actor_kernel(%arg0: i32, %arg1: memref<8x16xf32, #tpu.memory_space<vmem>>, %arg2: memref<8x128xf32, #tpu.memory_space<vmem>>, %arg3: memref<16x32xf32, #tpu.memory_space<vmem>>, %arg4: memref<1x32xf32, #tpu.memory_space<vmem>>, %arg5: memref<32x32xf32, #tpu.memory_space<vmem>>, %arg6: memref<1x32xf32, #tpu.memory_space<vmem>>, %arg7: memref<32x256xf32, #tpu.memory_space<vmem>>, %arg8: memref<1x256xf32, #tpu.memory_space<vmem>>, %arg9: memref<8x128xf32, #tpu.memory_space<vmem>>, %arg10: memref<8x128xf32, #tpu.memory_space<vmem>>) attributes {dimension_semantics = [#tpu.dimension_semantics<parallel>], iteration_bounds = array<i64: 1>, scalar_prefetch = 0 : i64, scratch_operands = 0 : i64, tpu.core_type = #tpu.core_type<tc>, window_params = [{transform_indices = @transform_0, window_bounds = array<i64: 8, 16>}, {transform_indices = @transform_1, window_bounds = array<i64: 8, 128>}, {pipeline_mode = #tpu.pipeline_mode<synchronous>, transform_indices = @transform_2, window_bounds = array<i64: 16, 32>}, {pipeline_mode = #tpu.pipeline_mode<synchronous>, transform_indices = @transform_3, window_bounds = array<i64: 1, 32>}, {pipeline_mode = #tpu.pipeline_mode<synchronous>, transform_indices = @transform_4, window_bounds = array<i64: 32, 32>}, {pipeline_mode = #tpu.pipeline_mode<synchronous>, transform_indices = @transform_5, window_bounds = array<i64: 1, 32>}, {pipeline_mode = #tpu.pipeline_mode<synchronous>, transform_indices = @transform_6, window_bounds = array<i64: 32, 256>}, {pipeline_mode = #tpu.pipeline_mode<synchronous>, transform_indices = @transform_7, window_bounds = array<i64: 1, 256>}, {transform_indices = @transform_8, window_bounds = array<i64: 8, 128>}, {transform_indices = @transform_9, window_bounds = array<i64: 8, 128>}]} {
    %c0 = arith.constant 0 : index
    %c0_0 = arith.constant 0 : index
    %0 = vector.load %arg1[%c0, %c0_0] : memref<8x16xf32, #tpu.memory_space<vmem>>, vector<8x16xf32>
    %c0_1 = arith.constant 0 : index
    %c0_2 = arith.constant 0 : index
    %1 = vector.load %arg3[%c0_1, %c0_2] : memref<16x32xf32, #tpu.memory_space<vmem>>, vector<16x32xf32>
    %cst = arith.constant dense<0.000000e+00> : vector<8x32xf32>
    %2 = tpu.matmul %0, %1, %cst {dimension_numbers = #tpu.dot_dimension_numbers<[1], [0], [0], [1], [0, 0, 1, 1], [], []>} : vector<8x16xf32>, vector<16x32xf32>, vector<8x32xf32> -> vector<8x32xf32>
    %c0_3 = arith.constant 0 : index
    %c0_4 = arith.constant 0 : index
    %3 = vector.load %arg4[%c0_3, %c0_4] : memref<1x32xf32, #tpu.memory_space<vmem>>, vector<1x32xf32>
    %4 = vector.broadcast %3 : vector<1x32xf32> to vector<8x32xf32>
    %5 = arith.addf %2, %4 : vector<8x32xf32>
    %cst_5 = arith.constant 0.000000e+00 : f32
    %6 = vector.broadcast %cst_5 : f32 to vector<8x32xf32>
    %7 = arith.maximumf %5, %6 : vector<8x32xf32>
    %c0_6 = arith.constant 0 : index
    %c0_7 = arith.constant 0 : index
    %8 = vector.load %arg5[%c0_6, %c0_7] : memref<32x32xf32, #tpu.memory_space<vmem>>, vector<32x32xf32>
    %cst_8 = arith.constant dense<0.000000e+00> : vector<8x32xf32>
    %9 = tpu.matmul %7, %8, %cst_8 {dimension_numbers = #tpu.dot_dimension_numbers<[1], [0], [0], [1], [0, 0, 1, 1], [], []>} : vector<8x32xf32>, vector<32x32xf32>, vector<8x32xf32> -> vector<8x32xf32>
    %c0_9 = arith.constant 0 : index
    %c0_10 = arith.constant 0 : index
    %10 = vector.load %arg6[%c0_9, %c0_10] : memref<1x32xf32, #tpu.memory_space<vmem>>, vector<1x32xf32>
    %11 = vector.broadcast %10 : vector<1x32xf32> to vector<8x32xf32>
    %12 = arith.addf %9, %11 : vector<8x32xf32>
    %cst_11 = arith.constant 0.000000e+00 : f32
    %13 = vector.broadcast %cst_11 : f32 to vector<8x32xf32>
    %14 = arith.maximumf %12, %13 : vector<8x32xf32>
    %c0_12 = arith.constant 0 : index
    %c0_13 = arith.constant 0 : index
    %15 = vector.load %arg7[%c0_12, %c0_13] : memref<32x256xf32, #tpu.memory_space<vmem>>, vector<32x256xf32>
    %cst_14 = arith.constant dense<0.000000e+00> : vector<8x256xf32>
    %16 = tpu.matmul %14, %15, %cst_14 {dimension_numbers = #tpu.dot_dimension_numbers<[1], [0], [0], [1], [0, 0, 1, 1], [], []>} : vector<8x32xf32>, vector<32x256xf32>, vector<8x256xf32> -> vector<8x256xf32>
    %c0_15 = arith.constant 0 : index
    %c0_16 = arith.constant 0 : index
    %17 = vector.load %arg8[%c0_15, %c0_16] : memref<1x256xf32, #tpu.memory_space<vmem>>, vector<1x256xf32>
    %18 = vector.broadcast %17 : vector<1x256xf32> to vector<8x256xf32>
    %19 = arith.addf %16, %18 : vector<8x256xf32>
    %20 = vector.extract_strided_slice %19 {offsets = [0, 0], sizes = [8, 128], strides = [1, 1]} : vector<8x256xf32> to vector<8x128xf32>
    %21 = vector.extract_strided_slice %19 {offsets = [0, 128], sizes = [8, 128], strides = [1, 1]} : vector<8x256xf32> to vector<8x128xf32>
    %cst_17 = arith.constant -2.000000e+01 : f32
    %cst_18 = arith.constant 2.000000e+00 : f32
    %22 = vector.broadcast %cst_17 : f32 to vector<8x128xf32>
    %23 = arith.maximumf %22, %21 : vector<8x128xf32>
    %24 = vector.broadcast %cst_18 : f32 to vector<8x128xf32>
    %25 = arith.minimumf %24, %23 : vector<8x128xf32>
    %26 = math.exp %25 : vector<8x128xf32>
    %c0_19 = arith.constant 0 : index
    %c0_20 = arith.constant 0 : index
    %27 = vector.load %arg2[%c0_19, %c0_20] : memref<8x128xf32, #tpu.memory_space<vmem>>, vector<8x128xf32>
    %28 = arith.mulf %26, %27 : vector<8x128xf32>
    %29 = arith.addf %20, %28 : vector<8x128xf32>
    %cst_21 = arith.constant -2.000000e+00 : f32
    %30 = vector.broadcast %cst_21 : f32 to vector<8x128xf32>
    %31 = arith.mulf %30, %29 : vector<8x128xf32>
    %cst_22 = arith.constant 0.000000e+00 : f32
    %32 = vector.broadcast %cst_22 : f32 to vector<8x128xf32>
    %33 = arith.maximumf %32, %31 : vector<8x128xf32>
    %34 = vector.broadcast %cst_22 : f32 to vector<8x128xf32>
    %35 = arith.subf %34, %31 : vector<8x128xf32>
    %36 = arith.cmpf one, %35, %35 : vector<8x128xf32>
    %37 = vector.broadcast %cst_22 : f32 to vector<8x128xf32>
    %38 = arith.addf %37, %31 : vector<8x128xf32>
    %39 = math.absf %35 : vector<8x128xf32>
    %cst_23 = arith.constant 0.000000e+00 : f32
    %40 = vector.broadcast %cst_23 : f32 to vector<8x128xf32>
    %41 = arith.subf %40, %39 : vector<8x128xf32>
    %42 = math.exp %41 : vector<8x128xf32>
    %43 = math.log1p %42 : vector<8x128xf32>
    %44 = arith.addf %33, %43 : vector<8x128xf32>
    %45 = arith.select %36, %38, %44 : vector<8x128xi1>, vector<8x128xf32>
    %cst_24 = arith.constant -5.000000e-01 : f32
    %46 = vector.broadcast %cst_24 : f32 to vector<8x128xf32>
    %47 = arith.mulf %46, %27 : vector<8x128xf32>
    %48 = arith.mulf %47, %27 : vector<8x128xf32>
    %49 = arith.subf %48, %25 : vector<8x128xf32>
    %cst_25 = arith.constant 0.918938517 : f32
    %50 = vector.broadcast %cst_25 : f32 to vector<8x128xf32>
    %51 = arith.subf %49, %50 : vector<8x128xf32>
    %cst_26 = arith.constant 0.693147182 : f32
    %52 = vector.broadcast %cst_26 : f32 to vector<8x128xf32>
    %53 = arith.subf %52, %29 : vector<8x128xf32>
    %54 = arith.subf %53, %45 : vector<8x128xf32>
    %cst_27 = arith.constant 2.000000e+00 : f32
    %55 = vector.broadcast %cst_27 : f32 to vector<8x128xf32>
    %56 = arith.mulf %55, %54 : vector<8x128xf32>
    %57 = arith.subf %51, %56 : vector<8x128xf32>
    %58 = tpu.iota {dimensions = array<i32: 1>} : vector<8x128xi32>
    %c8_i32 = arith.constant 8 : i32
    %59 = vector.broadcast %c8_i32 : i32 to vector<8x128xi32>
    %60 = arith.cmpi slt, %58, %59 : vector<8x128xi32>
    %cst_28 = arith.constant 0.000000e+00 : f32
    %61 = vector.broadcast %cst_28 : f32 to vector<8x128xf32>
    %62 = arith.select %60, %57, %61 : vector<8x128xi1>, vector<8x128xf32>
    %cst_29 = arith.constant dense<0.000000e+00> : vector<8xf32>
    %63 = vector.multi_reduction <add>, %62, %cst_29 [1] : vector<8x128xf32> to vector<8xf32>
    %64 = vector.shape_cast %63 : vector<8xf32> to vector<8x1xf32>
    %65 = math.tanh %29 : vector<8x128xf32>
    %cst_30 = arith.constant 1.000000e+00 : f32
    %66 = vector.broadcast %cst_30 : f32 to vector<8x128xf32>
    %67 = arith.mulf %66, %65 : vector<8x128xf32>
    %c0_31 = arith.constant 0 : index
    %c0_32 = arith.constant 0 : index
    %68 = vector.load %arg9[%c0_31, %c0_32] : memref<8x128xf32, #tpu.memory_space<vmem>>, vector<8x128xf32>
    tpu.vector_store %arg9[%c0_31, %c0_32], %67 {strides = array<i32>} : memref<8x128xf32, #tpu.memory_space<vmem>>, vector<8x128xf32>,
    %69 = vector.shape_cast %64 : vector<8x1xf32> to vector<8x1xf32>
    %70 = vector.broadcast %69 : vector<8x1xf32> to vector<8x128xf32>
    %c0_33 = arith.constant 0 : index
    %c0_34 = arith.constant 0 : index
    %71 = vector.load %arg10[%c0_33, %c0_34] : memref<8x128xf32, #tpu.memory_space<vmem>>, vector<8x128xf32>
    tpu.vector_store %arg10[%c0_33, %c0_34], %70 {strides = array<i32>} : memref<8x128xf32, #tpu.memory_space<vmem>>, vector<8x128xf32>,
    return
  }
  func.func @transform_0(%arg0: i32) -> (i32, i32) {
    %c0_i32 = arith.constant 0 : i32
    %c0_i32_0 = arith.constant 0 : i32
    return %arg0, %c0_i32 : i32, i32
  }
  func.func @transform_1(%arg0: i32) -> (i32, i32) {
    %c0_i32 = arith.constant 0 : i32
    %c0_i32_0 = arith.constant 0 : i32
    return %arg0, %c0_i32 : i32, i32
  }
  func.func @transform_2(%arg0: i32) -> (i32, i32) {
    %c0_i32 = arith.constant 0 : i32
    %c0_i32_0 = arith.constant 0 : i32
    %c0_i32_1 = arith.constant 0 : i32
    return %c0_i32, %c0_i32_0 : i32, i32
  }
  func.func @transform_3(%arg0: i32) -> (i32, i32) {
    %c0_i32 = arith.constant 0 : i32
    %c0_i32_0 = arith.constant 0 : i32
    %c0_i32_1 = arith.constant 0 : i32
    return %c0_i32, %c0_i32_0 : i32, i32
  }
  func.func @transform_4(%arg0: i32) -> (i32, i32) {
    %c0_i32 = arith.constant 0 : i32
    %c0_i32_0 = arith.constant 0 : i32
    %c0_i32_1 = arith.constant 0 : i32
    return %c0_i32, %c0_i32_0 : i32, i32
  }
  func.func @transform_5(%arg0: i32) -> (i32, i32) {
    %c0_i32 = arith.constant 0 : i32
    %c0_i32_0 = arith.constant 0 : i32
    %c0_i32_1 = arith.constant 0 : i32
    return %c0_i32, %c0_i32_0 : i32, i32
  }
  func.func @transform_6(%arg0: i32) -> (i32, i32) {
    %c0_i32 = arith.constant 0 : i32
    %c0_i32_0 = arith.constant 0 : i32
    %c0_i32_1 = arith.constant 0 : i32
    return %c0_i32, %c0_i32_0 : i32, i32
  }
  func.func @transform_7(%arg0: i32) -> (i32, i32) {
    %c0_i32 = arith.constant 0 : i32
    %c0_i32_0 = arith.constant 0 : i32
    %c0_i32_1 = arith.constant 0 : i32
    return %c0_i32, %c0_i32_0 : i32, i32
  }
  func.func @transform_8(%arg0: i32) -> (i32, i32) {
    %c0_i32 = arith.constant 0 : i32
    %c0_i32_0 = arith.constant 0 : i32
    return %arg0, %c0_i32 : i32, i32
  }
  func.func @transform_9(%arg0: i32) -> (i32, i32) {
    %c0_i32 = arith.constant 0 : i32
    %c0_i32_0 = arith.constant 0 : i32
    return %arg0, %c0_i32 : i32, i32
  }
}

</mosaic_0001>

<bundles_post_ra>
// kernel: tpu_custom_call.1
= control target key start
LH: loop header
LB: loop body
LE: loop exit
PB: predicated region body
PF: predicated region fallthrough
CT: control target
= control target key end

     0   :  { %15 = vsyncpa [#allocation3], 0  ;;  %s837_s0 = inlined_call_operand.hbm [shape: f32[8,16], index: 0, kind: input, shape index: {}]   ;;  %s838_s1 = inlined_call_operand.hbm [shape: f32[8,128], index: 1, kind: input, shape index: {}]   ;;  %s839_s2 = inlined_call_operand.hbm [shape: f32[16,32], index: 2, kind: input, shape index: {}]   ;;  %s840_s3 = inlined_call_operand.vmem [shape: f32[1,32], index: 3, kind: input, shape index: {}]   ;;  %s841_s4 = inlined_call_operand.hbm [shape: f32[32,32], index: 4, kind: input, shape index: {}]   ;;  %s842_s5 = inlined_call_operand.vmem [shape: f32[1,32], index: 5, kind: input, shape index: {}]   ;;  %s843_s6 = inlined_call_operand.hbm [shape: f32[32,256], index: 6, kind: input, shape index: {}]   ;;  %s844_s7 = inlined_call_operand.vmem [shape: f32[1,256], index: 7, kind: input, shape index: {}]   ;;  %s845_s8 = inlined_call_operand.hbm [shape: f32[8,128], index: 8, kind: output, shape index: {0}]   ;;  %s846_s9 = inlined_call_operand.hbm [shape: f32[8,128], index: 9, kind: output, shape index: {1}]  }
   0x1   :  { %16 = vsyncpa [#allocation6], 0 }
   0x2   :  { %17 = vsyncpa [#allocation9], 0 }
   0x3   :  { %18 = vsyncpa [#allocation4], 0 }
   0x4   :  { %19 = vsyncpa [#allocation13], 0  ;;  %s672_s30 = smov [#allocation5]   ;;  %s508_s13 = scalar_lea.hbm %s838_s1, 128 }
   0x5   :  { %s36_s10 = sshll.u32 %s672_s30, 4  ;;  %p509_p0 = scmp.ne.s32.totalorder %s838_s1, %s508_s13  ;;  %s37_s10 = int_to_ptr.vmem [resolvable:$true] %s36_s10 }
   0x6   :  { %p512_p1 = scmp.lt.u32.totalorder %s508_s13, %s838_s1 }
   0x8   :  { %p514_p2 = pnand %p512_p1, %p509_p0 }
   0xa   :  { %517 = shalt.err (!%p514_p2)
}
   0xb   :  { %s518_s18 = scalar_lea.vmem %s37_s10, 128  ;;  %p523_p4 = scmp.lt.s32.totalorder %s37_s10, %s37_s10 }
   0xc   :  { %p519_p3 = scmp.ne.s32.totalorder %s37_s10, %s518_s18  ;;  %p524_p5 = scmp.lt.s32.totalorder %s518_s18, %s518_s18 }
   0xe   :  { %p525_p6 = por %p524_p5, %p523_p4 }
  0x10   :  { %p526_p7 = pnand %p525_p6, %p519_p3 }
  0x12   :  { %529 = shalt.err (!%p526_p7)
}
  0x13   :  { %39 = dma.hbm_to_vmem [thread:$0]  %s838_s1, 128, %s37_s10, [#allocation6]  }
  0x14   :  { %s673_s21 = smov [#allocation8]   ;;  %s674_s23 = smov [#allocation2]  }
  0x15   :  { %s59_s22 = sshll.u32 %s673_s21, 4  ;;  %s26_s24 = sshll.u32 %s674_s23, 4  ;;  %s60_s22 = int_to_ptr.vmem [resolvable:$true] %s59_s22  ;;  %s27_s24 = int_to_ptr.vmem [resolvable:$true] %s26_s24 }
  0x16   :  { %s530_s27 = scalar_lea.hbm %s841_s4, 512 }
  0x17   :  { %p531_p8 = scmp.ne.s32.totalorder %s841_s4, %s530_s27  ;;  %p534_p9 = scmp.lt.u32.totalorder %s530_s27, %s841_s4 }
  0x19   :  { %p536_p10 = pnand %p534_p9, %p531_p8 }
  0x1b   :  { %539 = shalt.err (!%p536_p10)
}
  0x1c   :  { %s540_s1 = scalar_lea.vmem %s60_s22, 512  ;;  %p545_p12 = scmp.lt.s32.totalorder %s60_s22, %s60_s22 }
  0x1d   :  { %p541_p11 = scmp.ne.s32.totalorder %s60_s22, %s540_s1  ;;  %p546_p13 = scmp.lt.s32.totalorder %s540_s1, %s540_s1 }
  0x1f   :  { %p547_p0 = por %p546_p13, %p545_p12 }
  0x21   :  { %p548_p1 = pnand %p547_p0, %p541_p11 }
  0x23   :  { %551 = shalt.err (!%p548_p1)
}
  0x24   :  { %s675_s10 = smov 128   ;;  %s676_s12 = smov 8  }
  0x25   :  { %65 = dma.hbm_to_vmem [thread:$0]  %s841_s4, 512, %s60_s22, [#allocation9], %s675_s10, %s675_s10, %s676_s12  }
  0x26   :  { %s552_s17 = scalar_lea.hbm %s837_s0, 128 }
  0x27   :  { %p553_p2 = scmp.ne.s32.totalorder %s837_s0, %s552_s17  ;;  %p556_p3 = scmp.lt.u32.totalorder %s552_s17, %s837_s0 }
  0x29   :  { %p558_p4 = pnand %p556_p3, %p553_p2 }
  0x2b   :  { %561 = shalt.err (!%p558_p4)
}
  0x2c   :  { %s562_s23 = scalar_lea.vmem %s27_s24, 128  ;;  %p567_p6 = scmp.lt.s32.totalorder %s27_s24, %s27_s24 }
  0x2d   :  { %p563_p5 = scmp.ne.s32.totalorder %s27_s24, %s562_s23  ;;  %p568_p7 = scmp.lt.s32.totalorder %s562_s23, %s562_s23 }
  0x2f   :  { %p569_p8 = por %p568_p7, %p567_p6 }
  0x31   :  { %p570_p9 = pnand %p569_p8, %p563_p5 }
  0x33   :  { %573 = shalt.err (!%p570_p9)
}
  0x34   :  { %29 = dma.hbm_to_vmem [thread:$0]  %s837_s0, 128, %s27_s24, [#allocation3]  }
  0x35   :  { %s677_s25 = smov [#allocation7]   ;;  %s678_s27 = smov [#allocation10]  }
  0x36   :  { %s45_s26 = sshll.u32 %s677_s25, 4  ;;  %s73_s28 = sshll.u32 %s678_s27, 4  ;;  %s46_s26 = int_to_ptr.vmem [resolvable:$true] %s45_s26  ;;  %s74_s28 = int_to_ptr.vmem [resolvable:$true] %s73_s28 }
  0x37   :  { %s574_s11 = scalar_lea.hbm %s839_s2, 256 }
  0x38   :  { %p575_p10 = scmp.ne.s32.totalorder %s839_s2, %s574_s11  ;;  %p578_p11 = scmp.lt.u32.totalorder %s574_s11, %s839_s2 }
  0x3a   :  { %p580_p12 = pnand %p578_p11, %p575_p10 }
  0x3c   :  { %583 = shalt.err (!%p580_p12)
}
  0x3d   :  { %s584_s0 = scalar_lea.vmem %s46_s26, 256  ;;  %p589_p0 = scmp.lt.s32.totalorder %s46_s26, %s46_s26 }
  0x3e   :  { %p585_p13 = scmp.ne.s32.totalorder %s46_s26, %s584_s0  ;;  %p590_p1 = scmp.lt.s32.totalorder %s584_s0, %s584_s0 }
  0x40   :  { %p591_p2 = por %p590_p1, %p589_p0 }
  0x42   :  { %p592_p3 = pnand %p591_p2, %p585_p13 }
  0x44   :  { %595 = shalt.err (!%p592_p3)
}
  0x45   :  { %51 = dma.hbm_to_vmem [thread:$0]  %s839_s2, 256, %s46_s26, [#allocation6], %s675_s10, %s675_s10, %s676_s12  }
  0x46   :  { %s596_s19 = scalar_lea.hbm %s843_s6, 1024 }
  0x47   :  { %p597_p4 = scmp.ne.s32.totalorder %s843_s6, %s596_s19  ;;  %p600_p5 = scmp.lt.u32.totalorder %s596_s19, %s843_s6 }
  0x49   :  { %p602_p6 = pnand %p600_p5, %p597_p4 }
  0x4b   :  { %605 = shalt.err (!%p602_p6)
}
  0x4c   :  { %s606_s22 = scalar_lea.vmem %s74_s28, 1024  ;;  %p611_p8 = scmp.lt.s32.totalorder %s74_s28, %s74_s28 }
  0x4d   :  { %p607_p7 = scmp.ne.s32.totalorder %s74_s28, %s606_s22  ;;  %p612_p9 = scmp.lt.s32.totalorder %s606_s22, %s606_s22 }
  0x4f   :  { %p613_p10 = por %p612_p9, %p611_p8 }
  0x51   :  { %p614_p11 = pnand %p613_p10, %p607_p7 }
  0x53   :  { %617 = shalt.err (!%p614_p11)
}
  0x54   :  { %s679_s2 = smov 256   ;;  %s680_s10 = smov 16  }
  0x55   :  { %79 = dma.hbm_to_vmem [thread:$0]  %s843_s6, 1024, %s74_s28, [#allocation9], %s679_s2, %s679_s2, %s680_s10  }
  0x56   :  { %662 = dma.done.wait [#allocation3], 128  }
  0x57   :  { %663 = vsyncadd [#allocation3], 4294967168 }
  0x58   :  { %664 = dma.done.wait [#allocation6], 384  }
  0x59   :  { %665 = vsyncadd [#allocation6], 4294966912 }
  0x5a   :  { %666 = dma.done.wait [#allocation9], 1536  }
  0x5b   :  { %667 = vsyncadd [#allocation9], 4294965760  ;;  %v681_v0 = vmov 0.0|0.0   ;;  %vm682_vm0 = vmmov 0   ;;  %v683_v1 = vmov 0.0   ;;  %v98_v2 = vld [vmem:[#allocation7] sm:$0xff]  ;;  %v278_v34 = vlaneseq }
  0x5c   :  { %469 = vmatprep.subr.bf16.mxu0 %v681_v0  ;;  %455 = vmatprep.mubr.msk.f32.mxu0 %vm682_vm0, %v683_v1  ;;  %v99_v3 = vld [vmem:[#allocation7 + $0x8] sm:$0xff]  ;;  %v182_v5 = vld [vmem:[#allocation8] sm:$0xff]  ;;  %v183_v6 = vld [vmem:[#allocation8 + $0x8] sm:$0xff]  ;;  %vm107_vm1 = vcmask 130048   ;;  %vm193_vm2 = vcmask 261120  }
  0x5d   :  { %472 = vmatprep.subr.bf16.mxu1 %v681_v0  ;;  %466 = vmatprep.mubr.msk.f32.mxu1 %vm682_vm0, %v683_v1  ;;  %v470_v4 = vpack.c.bf16 %v99_v3, %v98_v2  ;;  %v473_v7 = vpack.c.bf16 %v183_v6, %v182_v5  ;;  %v97_v8 = vld [vmem:[#allocation2] sm:$0xff]  ;;  %v184_v9 = vld [vmem:[#allocation8 + $0x10] sm:$0xff]  ;;  %v185_v10 = vld [vmem:[#allocation8 + $0x18] sm:$0xff]  ;;  %v279_v35 = vshrl.u32 %v278_v34, 7 }
  0x5e   :  { %v476_v11 = vpack.c.bf16 %v185_v10, %v184_v9  ;;  %v269_v12 = vld [vmem:[#allocation10 + $0x8] sm:$0xff]  ;;  %v271_v13 = vld [vmem:[#allocation10 + $0x18] sm:$0xff]  ;;  %v268_v14 = vld [vmem:[#allocation10] sm:$0xff]  ;;  %v398_v10 = vand.u32 127, %v278_v34 }
  0x5f   :  { %471 = vmatpush3.bf16.msra.mxu0 %v470_v4  ;;  %474 = vmatpush3.bf16.msra.mxu1 %v473_v7  ;;  %v478_v15 = vpack.c.bf16 %v271_v13, %v269_v12  ;;  %v270_v16 = vld [vmem:[#allocation10 + $0x10] sm:$0xff]  ;;  %v437_v18 = vld [vmem:[%s840_s3] ss:$0 sm:$0xff]  ;;  %v273_v23 = vld [vmem:[#allocation10 + $0x28] sm:$0xff]  ;;  %v284_v36 = vsub.s32 1, %v279_v35  ;;  %v280_v45 = vsub.s32 0, %v279_v35 }
  0x60   :  { %475 = vmatprep.subr.bf16.mxu1 %v681_v0  ;;  %v480_v17 = vpack.c.bf16 %v270_v16, %v268_v14  ;;  %v275_v24 = vld [vmem:[#allocation10 + $0x38] sm:$0xff]  ;;  %v272_v26 = vld [vmem:[#allocation10 + $0x20] sm:$0xff]  ;;  %v274_v27 = vld [vmem:[#allocation10 + $0x30] sm:$0xff]  ;;  %vm399_vm5 = vcmp.lt.s32.totalorder %v398_v10, 8 }
  0x61   :  { %479 = vmatprep.subr.bf16.mxu0 %v478_v15  ;;  %v482_v25 = vpack.c.bf16 %v275_v24, %v273_v23  ;;  %v484_v28 = vpack.c.bf16 %v274_v27, %v272_v26  ;;  %v439_v29 = vld [vmem:[%s842_s5] ss:$0 sm:$0xff]  ;;  %v366_v48 = vld [vmem:[#allocation5] sm:$0xff]  ;;  %s684_s5 = smov [#allocation11]  }
  0x62   :  { %456 = vmatmul.mubr.msk.f32.vlgmr.msra.gmra.mrb[0].mxu0 %vm107_vm1, %v97_v8  ;;  %v276_v37 = vld [vmem:[%s844_s7] sm:$0x3]  ;;  %v389_v61 = vmul.f32 -0.5, %v366_v48  ;;  %s412_s7 = sshll.u32 %s684_s5, 4  ;;  %s413_s7 = int_to_ptr.vmem [resolvable:$true] %s412_s7 }
  0x63   :  { %355 = vmatprep.mubr.f32.mxu0 %v683_v1  ;;  %477 = vmatpush3.bf16.msra.mxu1 %v476_v11  ;;  %v285_v38 = vrot.slane %v276_v37, %v284_v36  ;;  %v281_v46 = vrot.slane %v276_v37, %v280_v45  ;;  %s618_s30 = scalar_lea.vmem %s413_s7, 128  ;;  %p623_p13 = scmp.lt.s32.totalorder %s413_s7, %s413_s7 }
  0x64   :  { %481 = vmatpush1.bf16.msra.mxu0 %v480_v17  ;;  %v390_v1 = vmul.f32 %v389_v61, %v366_v48  ;;  %p619_p12 = scmp.ne.s32.totalorder %s413_s7, %s618_s30  ;;  %p624_p0 = scmp.lt.s32.totalorder %s618_s30, %s618_s30 }
  0x65   :  { %483 = vmatprep.subr.bf16.mxu0 %v482_v25 }
  0x66   :  { %p625_p1 = por %p624_p0, %p623_p13 }
  0x68   :  { %485 = vmatpush1.bf16.msra.mxu0 %v484_v28  ;;  %p626_p2 = pnand %p625_p1, %p619_p12 }
 0x135   :  { %v177_v19 = vpop.f32.mrb[0].mxu0 }
 0x136   :  { %v178_v20 = vadd.f32 %v437_v18, %v177_v19  ;;  %v457_v21 = vpop.f32.mrb[1].mxu0 }
 0x138   :  { %v181_v22 = vmax.f32 %v178_v20, 0.0 }
 0x13a   :  { %467 = vmatmul.mubr.msk.f32.vlgmr.msra.gmra.mrb[0].mxu1 %vm193_vm2, %v181_v22 }
 0x20d   :  { %v263_v30 = vpop.f32.mrb[0].mxu1 }
 0x20e   :  { %v264_v31 = vadd.f32 %v439_v29, %v263_v30  ;;  %v468_v32 = vpop.f32.mrb[1].mxu1 }
 0x210   :  { %v267_v33 = vmax.f32 %v264_v31, 0.0 }
 0x212   :  { %441 = vmatmul.mubr.msk.f32.vlgmr.msra.gmra.mrb[2].mxu0 %vm193_vm2, %v267_v33 }
 0x2e5   :  { %v357_v39 = vpop.f32.mrb[2].mxu0 }
 0x2e6   :  { %v359_v40 = vpop.f32.mrb[3].mxu0  ;;  %v358_v49 = vadd.f32 %v357_v39, %v281_v46 }
 0x2e7   :  { %v360_v41 = vadd.f32 %v359_v40, %v285_v38 }
 0x2e9   :  { %v362_v42 = vmax.f32 %v360_v41, -20.0 }
 0x2eb   :  { %v363_v43 = vmin.f32 %v362_v42, 2.0 }
 0x2ed   :  { %v364_v44 = vmul.f32 1.442695, %v363_v43  ;;  %v391_v7 = vsub.f32 %v390_v1, %v363_v43 }
 0x2ef   :  { %500 = vpow2.f32 %v364_v44  ;;  %v442_v12 = vadd.f32 -0.9189385, %v391_v7 }
 0x2f9   :  { %v501_v47 = vpop.eup %500 }
 0x2fa   :  { %v367_v50 = vmul.f32 %v501_v47, %v366_v48 }
 0x2fc   :  { %v368_v51 = vadd.f32 %v367_v50, %v358_v49 }
 0x2fe   :  { %v369_v52 = vmul.f32 -2.0, %v368_v51  ;;  %502 = vtanh.f32 %v368_v51  ;;  %v393_v8 = vsub.f32 0.6931472, %v368_v51 }
 0x300   :  { %v371_v53 = vsub.f32 0.0, %v369_v52  ;;  %v370_v4 = vmax.f32 %v369_v52, 0.0 }
 0x302   :  { %v374_v54 = vand.u32 2147483647, %v371_v53  ;;  %vm372_vm4 = vcmp.ne.f32.partialorder %v371_v53, %v371_v53 }
 0x304   :  { %v375_v55 = vsub.f32 0.0, %v374_v54 }
 0x306   :  { %v376_v56 = vmul.f32 1.442695, %v375_v55 }
 0x308   :  { %v503_v57 = vpop.eup %502  ;;  %504 = vpow2.f32 %v376_v56 }
 0x309   :  { %404 = vst [vmem:[#allocation11] sm:$0xff] %v503_v57 }
 0x312   :  { %v505_v58 = vpop.eup %504 }
 0x313   :  { %v378_v59 = vadd.f32 1.0, %v505_v58  ;;  %v381_v60 = vmul.f32 -0.5, %v505_v58  ;;  %v384_v63 = vand.u32 2147483647, %v505_v58 }
 0x315   :  { %506 = vlog2.f32 %v378_v59  ;;  %v382_v62 = vadd.f32 1.0, %v381_v60  ;;  %vm385_vm3 = vcmp.lt.f32.partialorder %v384_v63, 0.0004427343 }
 0x317   :  { %v383_v3 = vmul.f32 %v505_v58, %v382_v62 }
 0x31f   :  { %v507_v0 = vpop.eup %506 }
 0x320   :  { %v380_v2 = vmul.f32 0.6931472, %v507_v0 }
 0x322   :  { %v386_v5 = vsel %vm385_vm3, %v383_v3, %v380_v2 }
 0x323   :  { %v387_v6 = vadd.f32 %v386_v5, %v370_v4 }
 0x325   :  { %v388_v9 = vsel %vm372_vm4, %v369_v52, %v387_v6 }
 0x326   :  { %v394_v11 = vsub.f32 %v393_v8, %v388_v9 }
 0x328   :  { %v395_v13 = vmul.f32 2.0, %v394_v11 }
 0x32a   :  { %v396_v14 = vsub.f32 %v442_v12, %v395_v13 }
 0x32c   :  { %v400_v15 = vsel %vm399_vm5, %v396_v14, 0.0 }
 0x32d   :  { %401 = vadd.xlane.f32.xlu0 %v400_v15 }
 0x32e   :  { %629 = shalt.err (!%p626_p2)
}
 0x32f   :  { %s630_s13 = scalar_lea.hbm %s845_s8, 128 }
 0x330   :  { %p631_p3 = scmp.ne.s32.totalorder %s845_s8, %s630_s13  ;;  %p634_p4 = scmp.lt.u32.totalorder %s630_s13, %s845_s8 }
 0x332   :  { %p636_p5 = pnand %p634_p4, %p631_p3 }
 0x334   :  { %639 = shalt.err (!%p636_p5)
}
 0x335   :  { %415 = dma.vmem_to_hbm [thread:$0]  %s413_s7, 128, %s845_s8, [#allocation4]  }
 0x336   :  { %s685_s18 = smov [#allocation12]  }
 0x337   :  { %s422_s19 = sshll.u32 %s685_s18, 4  ;;  %s423_s19 = int_to_ptr.vmem [resolvable:$true] %s422_s19 }
 0x338   :  { %s640_s20 = scalar_lea.vmem %s423_s19, 128  ;;  %p645_p7 = scmp.lt.s32.totalorder %s423_s19, %s423_s19 }
 0x339   :  { %p641_p6 = scmp.ne.s32.totalorder %s423_s19, %s640_s20  ;;  %p646_p8 = scmp.lt.s32.totalorder %s640_s20, %s640_s20 }
 0x33b   :  { %p647_p9 = por %p646_p8, %p645_p7 }
 0x33d   :  { %p648_p10 = pnand %p647_p9, %p641_p6 }
 0x3ba   :  { %v402_v16 = vpop.xlane.xlu0 %401 }
 0x3bb   :  { %405 = vst [vmem:[#allocation12] sm:$0xff] %v402_v16 }
 0x3bc   :  { %651 = shalt.err (!%p648_p10)
}
 0x3bd   :  { %s652_s4 = scalar_lea.hbm %s846_s9, 128 }
 0x3be   :  { %p653_p11 = scmp.ne.s32.totalorder %s846_s9, %s652_s4  ;;  %p656_p12 = scmp.lt.u32.totalorder %s652_s4, %s846_s9 }
 0x3c0   :  { %p658_p13 = pnand %p656_p12, %p653_p11 }
 0x3c2   :  { %661 = shalt.err (!%p658_p13)
}
 0x3c3   :  { %425 = dma.vmem_to_hbm [thread:$0]  %s423_s19, 128, %s846_s9, [#allocation13]  }
 0x3c4   :  { %668 = dma.done.wait [#allocation4], 128  }
 0x3c5   :  { %669 = vsyncadd [#allocation4], 4294967168 }
 0x3c6   :  { %670 = dma.done.wait [#allocation13], 128  }
 0x3c7   :  { %671 = vsyncadd [#allocation13], 4294967168 }
 0x3c8   :  { %432 = vsyncpa [#allocation3], 1 }
 0x3c9   :  { %433 = vsyncpa [#allocation6], 1 }
 0x3ca   :  { %434 = vsyncpa [#allocation9], 1 }
 0x3cb   :  { %435 = vsyncpa [#allocation4], 1 }
 0x3cc   :  { %436 = vsyncpa [#allocation13], 1 }

</bundles_post_ra>
